<compile_context>
chip_gen: v7x
topology: tpu7x:2x2x1
jax: 0.10.0
libtpu: 0.0.40
codegen_flags: <defaults>
</compile_context>

<pallas_src>
import math

import jax
import jax.numpy as jnp
from jax.experimental import pallas as pl
from jax.experimental.pallas import tpu as pltpu


def _make_resblock_kernel(M, H, L, K):
    """Kernel over one (M, L) activation slab (M = Gb*H sublane rows)."""
    P = K // 2

    def kernel(x_ref, band1_ref, bias1_ref, band2_ref, bias2_ref, o_ref):
        x = x_ref[...]                                        # (M, L) f32

        # Per-tap validity masks for the H-direction "same" zero padding.
        # Rows are stacked images (Gb blocks of H rows); a tap reaching past
        # an image's top/bottom row must contribute zero.
        local = jax.lax.broadcasted_iota(jnp.int32, (M, L), 0) % H
        masks = {}
        for dh in range(K):
            if dh == P:
                continue
            lo = P - dh
            masks[dh] = (local >= lo) & (local < H + lo)

        def conv(act, band_ref, bias_ref):
            # Pre-shift activations along H (sublane roll on the XLU) and
            # stack the K taps along the contraction axis -> single MXU dot.
            parts = []
            for dh in range(K):
                if dh == P:
                    parts.append(act)                         # center tap
                else:
                    r = pltpu.roll(act, shift=(P - dh) % M, axis=0)
                    parts.append(jnp.where(masks[dh], r, 0.0))
            a = jnp.concatenate(parts, axis=1)                # (M, K*L)
            out = jnp.dot(a.astype(band_ref.dtype), band_ref[...],
                          preferred_element_type=jnp.float32)
            return out + bias_ref[...]                        # (1, L) broadcast

        h1 = conv(jnp.maximum(x, 0.0), band1_ref, bias1_ref)
        h2 = conv(jnp.maximum(h1, 0.0), band2_ref, bias2_ref)
        o_ref[...] = (h2 + x).astype(o_ref.dtype)             # residual add

    return kernel


def _band_matrix(wgt, W):
    """Fold W-taps, input-channel contraction and 'same' W-padding of an HWIO
    weight (K, K, C, Co) into a stacked (K*W*C, W*Co) matrix whose row blocks
    (one per H-tap) match the kernel's concat order."""
    K, _, C, Co = wgt.shape
    P = K // 2
    wi = jnp.arange(W)[:, None]                 # input column
    wo = jnp.arange(W)[None, :]                 # output column
    dw = wi - wo + P                            # (W, W) tap index
    valid = (dw >= 0) & (dw < K)                # 'same' padding in W
    dwc = jnp.clip(dw, 0, K - 1)
    blocks = wgt[:, dwc]                        # (K, W, W, C, Co)
    blocks = jnp.where(valid[None, :, :, None, None], blocks, 0.0)
    band = jnp.transpose(blocks, (0, 1, 3, 2, 4)).reshape(K, W * C, W * Co)
    return band.reshape(K * W * C, W * Co)


def residual_block(x_nhwc, w1, b1, w2, b2, *, band_dtype=jnp.float32,
                   max_rows=256):
    """x_nhwc: (N, H, W, C) f32; w*: (K, K, C, C) HWIO; b*: (C,).

    band_dtype=jnp.bfloat16 halves weight VMEM and ~doubles MXU rate on
    v6e/v7x at larger shapes (loosen the check tolerance accordingly);
    f32 kept as the default so the demo's tight tolerance holds on all gens.
    """
    N, H, W, C = x_nhwc.shape
    K = w1.shape[0]

    # Pad channels so the lane extent L = W*Cp is a multiple of 128
    # (unmasked lane-dense loads/stores); fall back to no padding.
    Cp = C
    for cand in range(C, 2 * C + 9):
        if (W * cand) % 128 == 0:
            Cp = cand
            break
    L = W * Cp
    # TODO(synk): for real gfootball frames (72x96, more channels) the band
    # grows as (W*C)^2 -- tile W (blocked im2col) and cast bands to bf16 to
    # stay inside v7x's 64 MiB VMEM.

    pad_c = Cp - C
    x_p = jnp.pad(x_nhwc, ((0, 0), (0, 0), (0, 0), (0, pad_c)))
    w1_p = jnp.pad(w1, ((0, 0), (0, 0), (0, pad_c), (0, pad_c)))
    w2_p = jnp.pad(w2, ((0, 0), (0, 0), (0, pad_c), (0, pad_c)))
    b1_p = jnp.pad(jnp.reshape(b1, (-1,)), (0, pad_c))
    b2_p = jnp.pad(jnp.reshape(b2, (-1,)), (0, pad_c))

    # Batch on the sublane axis: pure contiguous reshape, no transpose.
    x2 = x_p.reshape(N * H, L)

    band1 = _band_matrix(w1_p, W).astype(band_dtype)          # (K*L, L)
    band2 = _band_matrix(w2_p, W).astype(band_dtype)
    bias1 = jnp.tile(b1_p, W)[None, :].astype(jnp.float32)    # (1, L)
    bias2 = jnp.tile(b2_p, W)[None, :].astype(jnp.float32)

    # Image-group size per grid step: fill the MXU M dimension, but keep
    # >= 2 "parallel" grid steps when possible so both v7x TensorCores work.
    divs = [d for d in range(1, N + 1) if N % d == 0]
    cands = [d for d in divs if d * H <= max_rows and N // d >= 2]
    if not cands:
        cands = [d for d in divs if d * H <= max_rows] or [1]
    Gb = max(cands)
    Ng = N // Gb
    M = Gb * H

    # Explicit VMEM budget: double-buffered x/out blocks, single-buffered
    # bands/biases, plus headroom for in-kernel temporaries.
    wbytes = jnp.dtype(band_dtype).itemsize
    est = (2 * 2 * M * L * 4              # x + out blocks, double-buffered
           + 2 * K * L * L * wbytes       # two stacked band matrices
           + 2 * L * 4                    # biases
           + 2 * 2 * M * K * L * 4)       # stacked activations per conv
    vmem_limit = int(min(max(4 * est, 8 << 20), 48 << 20))

    kernel = _make_resblock_kernel(M, H, L, K)
    grid_spec = pltpu.PrefetchScalarGridSpec(
        num_scalar_prefetch=0,
        grid=(Ng,),
        in_specs=[
            pl.BlockSpec((M, L), lambda g: (g, 0)),                # x slab
            pl.BlockSpec((K * L, L), lambda g: (0, 0),
                         pipeline_mode=pl.Buffered(1)),            # conv1 band
            pl.BlockSpec((1, L), lambda g: (0, 0),
                         pipeline_mode=pl.Buffered(1)),            # conv1 bias
            pl.BlockSpec((K * L, L), lambda g: (0, 0),
                         pipeline_mode=pl.Buffered(1)),            # conv2 band
            pl.BlockSpec((1, L), lambda g: (0, 0),
                         pipeline_mode=pl.Buffered(1)),            # conv2 bias
        ],
        out_specs=pl.BlockSpec((M, L), lambda g: (g, 0)),
    )
    out2 = pl.pallas_call(
        kernel,
        out_shape=jax.ShapeDtypeStruct((N * H, L), jnp.float32),
        grid_spec=grid_spec,
        compiler_params=pltpu.CompilerParams(
            dimension_semantics=("parallel",),
            vmem_limit_bytes=vmem_limit),
    )(x2, band1, bias1, band2, bias2)

    # TODO(synk): when used inside the full gfootball trunk, fuse several
    # residual blocks per pallas_call to amortize launch/DMA overhead (the
    # dominant cost at these demo shapes).
    return out2.reshape(N, H, W, Cp)[..., :C]


def residual_block_reference(x_nhwc, w1, b1, w2, b2):
    """Pure-JAX reference (lax.conv) for correctness checking."""
    dn = jax.lax.conv_dimension_numbers(
        x_nhwc.shape, w1.shape, ('NHWC', 'HWIO', 'NHWC'))
    h = jnp.maximum(x_nhwc, 0.0)
    h = jax.lax.conv_general_dilated(
        h, w1, (1, 1), 'SAME', dimension_numbers=dn,
        precision=jax.lax.Precision.HIGHEST) + b1
    h = jnp.maximum(h, 0.0)
    h = jax.lax.conv_general_dilated(
        h, w2, (1, 1), 'SAME', dimension_numbers=dn,
        precision=jax.lax.Precision.HIGHEST) + b2
    return h + x_nhwc


if __name__ == "__main__":
    # Small shapes consistent with ResidualBlock(i_channel=C, o_channel=C,
    # in_size=(H, W), kernel_size=3, stride=1).
    N, C, H, W = 2, 4, 16, 16
    K = 3

    key = jax.random.PRNGKey(0)
    kx, kw1, kw2 = jax.random.split(key, 3)

    # Xavier-uniform style weights (HWIO), zero biases (bias_init=0).
    fan_in = C * K * K
    fan_out = C * K * K
    bound = math.sqrt(6.0 / (fan_in + fan_out))
    w1 = jax.random.uniform(kw1, (K, K, C, C), jnp.float32, -bound, bound)
    w2 = jax.random.uniform(kw2, (K, K, C, C), jnp.float32, -bound, bound)
    b1 = jnp.zeros((C,), jnp.float32)
    b2 = jnp.zeros((C,), jnp.float32)

    # Input in PyTorch NCHW, transposed to the kernel's NHWC layout.
    x_nchw = jax.random.normal(kx, (N, C, H, W), jnp.float32)
    x_nhwc = jnp.transpose(x_nchw, (0, 2, 3, 1))

    out = residual_block(x_nhwc, w1, b1, w2, b2)
    out = jax.block_until_ready(out)

    ref = residual_block_reference(x_nhwc, w1, b1, w2, b2)
    assert out.shape == (N, H, W, C)
    max_err = float(jnp.max(jnp.abs(out - ref)))
    # Tolerance absorbs MXU-matmul vs XLA-conv accumulation-order differences.
    assert jnp.allclose(out, ref, atol=2e-3, rtol=2e-3), (
        f"mismatch vs reference (max abs err {max_err})")

    print("KERNEL_OK")
</pallas_src>

<mosaic_0001>
module attributes {stable_mosaic.version = 11 : i64} {
  func.func @kernel(%arg0: i32, %arg1: memref<16x128xf32, #tpu.memory_space<vmem>>, %arg2: memref<384x128xf32, #tpu.memory_space<vmem>>, %arg3: memref<1x128xf32, #tpu.memory_space<vmem>>, %arg4: memref<384x128xf32, #tpu.memory_space<vmem>>, %arg5: memref<1x128xf32, #tpu.memory_space<vmem>>, %arg6: memref<16x128xf32, #tpu.memory_space<vmem>>) attributes {dimension_semantics = [#tpu.dimension_semantics<parallel>], iteration_bounds = array<i64: 2>, scalar_prefetch = 0 : i64, scratch_operands = 0 : i64, tpu.core_type = #tpu.core_type<tc>, window_params = [{transform_indices = @transform_0, window_bounds = array<i64: 16, 128>}, {pipeline_mode = #tpu.pipeline_mode<synchronous>, transform_indices = @transform_1, window_bounds = array<i64: 384, 128>}, {pipeline_mode = #tpu.pipeline_mode<synchronous>, transform_indices = @transform_2, window_bounds = array<i64: 1, 128>}, {pipeline_mode = #tpu.pipeline_mode<synchronous>, transform_indices = @transform_3, window_bounds = array<i64: 384, 128>}, {pipeline_mode = #tpu.pipeline_mode<synchronous>, transform_indices = @transform_4, window_bounds = array<i64: 1, 128>}, {transform_indices = @transform_5, window_bounds = array<i64: 16, 128>}]} {
    %c0 = arith.constant 0 : index
    %c0_0 = arith.constant 0 : index
    %0 = vector.load %arg1[%c0, %c0_0] : memref<16x128xf32, #tpu.memory_space<vmem>>, vector<16x128xf32>
    %1 = tpu.iota {dimensions = array<i32: 0>} : vector<16x128xi32>
    %c16_i32 = arith.constant 16 : i32
    %c0_i32 = arith.constant 0 : i32
    %2 = arith.cmpi eq, %c16_i32, %c0_i32 : i32
    %c1_i32 = arith.constant 1 : i32
    %3 = arith.select %2, %c1_i32, %c16_i32 : i32
    %4 = vector.broadcast %3 : i32 to vector<16x128xi32>
    %5 = arith.remsi %1, %4 : vector<16x128xi32>
    %c0_i32_1 = arith.constant 0 : i32
    %6 = vector.broadcast %c0_i32_1 : i32 to vector<16x128xi32>
    %7 = arith.cmpi ne, %5, %6 : vector<16x128xi32>
    %c0_i32_2 = arith.constant 0 : i32
    %8 = vector.broadcast %c0_i32_2 : i32 to vector<16x128xi32>
    %9 = arith.cmpi slt, %5, %8 : vector<16x128xi32>
    %c0_i32_3 = arith.constant 0 : i32
    %10 = arith.cmpi slt, %3, %c0_i32_3 : i32
    %11 = vector.broadcast %10 : i1 to vector<16x128xi1>
    %12 = vector.broadcast %11 : vector<16x128xi1> to vector<16x128xi1>
    %13 = arith.xori %9, %12 : vector<16x128xi1>
    %14 = arith.andi %13, %7 : vector<16x128xi1>
    %15 = vector.broadcast %3 : i32 to vector<16x128xi32>
    %16 = arith.addi %5, %15 : vector<16x128xi32>
    %17 = arith.select %14, %16, %5 : vector<16x128xi1>, vector<16x128xi32>
    %c1_i32_4 = arith.constant 1 : i32
    %18 = vector.broadcast %c1_i32_4 : i32 to vector<16x128xi32>
    %19 = arith.cmpi sge, %17, %18 : vector<16x128xi32>
    %c17_i32 = arith.constant 17 : i32
    %20 = vector.broadcast %c17_i32 : i32 to vector<16x128xi32>
    %21 = arith.cmpi slt, %17, %20 : vector<16x128xi32>
    %22 = arith.andi %19, %21 : vector<16x128xi1>
    %c-1_i32 = arith.constant -1 : i32
    %23 = vector.broadcast %c-1_i32 : i32 to vector<16x128xi32>
    %24 = arith.cmpi sge, %17, %23 : vector<16x128xi32>
    %c15_i32 = arith.constant 15 : i32
    %25 = vector.broadcast %c15_i32 : i32 to vector<16x128xi32>
    %26 = arith.cmpi slt, %17, %25 : vector<16x128xi32>
    %27 = arith.andi %24, %26 : vector<16x128xi1>
    %cst = arith.constant 0.000000e+00 : f32
    %28 = vector.broadcast %cst : f32 to vector<16x128xf32>
    %29 = arith.maximumf %0, %28 : vector<16x128xf32>
    %c1_i32_5 = arith.constant 1 : i32
    %30 = tpu.dynamic_rotate %29 by %c1_i32_5 dim 0 : vector<16x128xf32>, i32 -> vector<16x128xf32>
    %cst_6 = arith.constant 0.000000e+00 : f32
    %31 = vector.broadcast %cst_6 : f32 to vector<16x128xf32>
    %32 = arith.select %22, %30, %31 : vector<16x128xi1>, vector<16x128xf32>
    %c15_i32_7 = arith.constant 15 : i32
    %33 = tpu.dynamic_rotate %29 by %c15_i32_7 dim 0 : vector<16x128xf32>, i32 -> vector<16x128xf32>
    %cst_8 = arith.constant 0.000000e+00 : f32
    %34 = vector.broadcast %cst_8 : f32 to vector<16x128xf32>
    %35 = arith.select %27, %33, %34 : vector<16x128xi1>, vector<16x128xf32>
    %36 = tpu.concatenate %32, %29, %35 in 1 : vector<16x128xf32>, vector<16x128xf32>, vector<16x128xf32> -> vector<16x384xf32>
    %c0_9 = arith.constant 0 : index
    %c0_10 = arith.constant 0 : index
    %37 = vector.load %arg2[%c0_9, %c0_10] : memref<384x128xf32, #tpu.memory_space<vmem>>, vector<384x128xf32>
    %cst_11 = arith.constant dense<0.000000e+00> : vector<16x128xf32>
    %38 = tpu.matmul %36, %37, %cst_11 {dimension_numbers = #tpu.dot_dimension_numbers<[1], [0], [0], [1], [0, 0, 1, 1], [], []>} : vector<16x384xf32>, vector<384x128xf32>, vector<16x128xf32> -> vector<16x128xf32>
    %c0_12 = arith.constant 0 : index
    %c0_13 = arith.constant 0 : index
    %39 = vector.load %arg3[%c0_12, %c0_13] : memref<1x128xf32, #tpu.memory_space<vmem>>, vector<1x128xf32>
    %40 = vector.broadcast %39 : vector<1x128xf32> to vector<16x128xf32>
    %41 = arith.addf %38, %40 : vector<16x128xf32>
    %cst_14 = arith.constant 0.000000e+00 : f32
    %42 = vector.broadcast %cst_14 : f32 to vector<16x128xf32>
    %43 = arith.maximumf %41, %42 : vector<16x128xf32>
    %c1_i32_15 = arith.constant 1 : i32
    %44 = tpu.dynamic_rotate %43 by %c1_i32_15 dim 0 : vector<16x128xf32>, i32 -> vector<16x128xf32>
    %cst_16 = arith.constant 0.000000e+00 : f32
    %45 = vector.broadcast %cst_16 : f32 to vector<16x128xf32>
    %46 = arith.select %22, %44, %45 : vector<16x128xi1>, vector<16x128xf32>
    %c15_i32_17 = arith.constant 15 : i32
    %47 = tpu.dynamic_rotate %43 by %c15_i32_17 dim 0 : vector<16x128xf32>, i32 -> vector<16x128xf32>
    %cst_18 = arith.constant 0.000000e+00 : f32
    %48 = vector.broadcast %cst_18 : f32 to vector<16x128xf32>
    %49 = arith.select %27, %47, %48 : vector<16x128xi1>, vector<16x128xf32>
    %50 = tpu.concatenate %46, %43, %49 in 1 : vector<16x128xf32>, vector<16x128xf32>, vector<16x128xf32> -> vector<16x384xf32>
    %c0_19 = arith.constant 0 : index
    %c0_20 = arith.constant 0 : index
    %51 = vector.load %arg4[%c0_19, %c0_20] : memref<384x128xf32, #tpu.memory_space<vmem>>, vector<384x128xf32>
    %cst_21 = arith.constant dense<0.000000e+00> : vector<16x128xf32>
    %52 = tpu.matmul %50, %51, %cst_21 {dimension_numbers = #tpu.dot_dimension_numbers<[1], [0], [0], [1], [0, 0, 1, 1], [], []>} : vector<16x384xf32>, vector<384x128xf32>, vector<16x128xf32> -> vector<16x128xf32>
    %c0_22 = arith.constant 0 : index
    %c0_23 = arith.constant 0 : index
    %53 = vector.load %arg5[%c0_22, %c0_23] : memref<1x128xf32, #tpu.memory_space<vmem>>, vector<1x128xf32>
    %54 = vector.broadcast %53 : vector<1x128xf32> to vector<16x128xf32>
    %55 = arith.addf %52, %54 : vector<16x128xf32>
    %56 = arith.addf %55, %0 : vector<16x128xf32>
    %c0_24 = arith.constant 0 : index
    %c0_25 = arith.constant 0 : index
    %57 = vector.load %arg6[%c0_24, %c0_25] : memref<16x128xf32, #tpu.memory_space<vmem>>, vector<16x128xf32>
    tpu.vector_store %arg6[%c0_24, %c0_25], %56 {strides = array<i32>} : memref<16x128xf32, #tpu.memory_space<vmem>>, vector<16x128xf32>,
    return
  }
  func.func @transform_0(%arg0: i32) -> (i32, i32) {
    %c0_i32 = arith.constant 0 : i32
    %c0_i32_0 = arith.constant 0 : i32
    return %arg0, %c0_i32 : i32, i32
  }
  func.func @transform_1(%arg0: i32) -> (i32, i32) {
    %c0_i32 = arith.constant 0 : i32
    %c0_i32_0 = arith.constant 0 : i32
    %c0_i32_1 = arith.constant 0 : i32
    return %c0_i32, %c0_i32_0 : i32, i32
  }
  func.func @transform_2(%arg0: i32) -> (i32, i32) {
    %c0_i32 = arith.constant 0 : i32
    %c0_i32_0 = arith.constant 0 : i32
    %c0_i32_1 = arith.constant 0 : i32
    return %c0_i32, %c0_i32_0 : i32, i32
  }
  func.func @transform_3(%arg0: i32) -> (i32, i32) {
    %c0_i32 = arith.constant 0 : i32
    %c0_i32_0 = arith.constant 0 : i32
    %c0_i32_1 = arith.constant 0 : i32
    return %c0_i32, %c0_i32_0 : i32, i32
  }
  func.func @transform_4(%arg0: i32) -> (i32, i32) {
    %c0_i32 = arith.constant 0 : i32
    %c0_i32_0 = arith.constant 0 : i32
    %c0_i32_1 = arith.constant 0 : i32
    return %c0_i32, %c0_i32_0 : i32, i32
  }
  func.func @transform_5(%arg0: i32) -> (i32, i32) {
    %c0_i32 = arith.constant 0 : i32
    %c0_i32_0 = arith.constant 0 : i32
    return %arg0, %c0_i32 : i32, i32
  }
}

</mosaic_0001>

<bundles_post_ra>
// kernel: tpu_custom_call.1
= control target key start
LH: loop header
LB: loop body
LE: loop exit
PB: predicated region body
PF: predicated region fallthrough
CT: control target
= control target key end

     0   :  { %10 = vsyncpa [#allocation3], 0  ;;  %s1789_s0 = inlined_call_operand.hbm [shape: f32[32,128], index: 0, kind: input, shape index: {}]   ;;  %s1790_s1 = inlined_call_operand.hbm [shape: f32[384,128], index: 1, kind: input, shape index: {}]   ;;  %s1791_s2 = inlined_call_operand.vmem [shape: f32[1,128], index: 2, kind: input, shape index: {}]   ;;  %s1792_s3 = inlined_call_operand.hbm [shape: f32[384,128], index: 3, kind: input, shape index: {}]   ;;  %s1793_s4 = inlined_call_operand.vmem [shape: f32[1,128], index: 4, kind: input, shape index: {}]   ;;  %s1794_s5 = inlined_call_operand.hbm [shape: f32[32,128], index: 5, kind: output, shape index: {}]  }
   0x1   :  { %12 = vsyncpa [#allocation3 + $0x1], 0 }
   0x2   :  { %13 = vsyncpa [#allocation6], 0 }
   0x3   :  { %14 = vsyncpa [#allocation4], 0 }
   0x4   :  { %16 = vsyncpa [#allocation4 + $0x1], 0  ;;  %s1468_s18 = smov 0   ;;  %s1470_s19 = smov 0  }
   0x5   :  { %s1472_s20 = smov 0   ;;  %s1474_s21 = smov 0  }
   0x6 LB: > { %s1489_s22 = sadd.s32 4294967295, %s1428_s21   ;;  %s865_s23 = sadd.s32 4294967294, %s1428_s21   ;;  %s1428_s21 = sphi %s1474_s21, %s1818_s21   ;;  %s1424_s20 = sphi %s1472_s20, %s1817_s20   ;;  %s1420_s19 = sphi %s1470_s19, %s1816_s19   ;;  %s1416_s18 = sphi %s1468_s18, %s1815_s18  }
   0x7   : > { %p42_p0 = scmp.ne.s32.totalorder %s1420_s19, %s1416_s18  ;;  %p1795_p1 = scmp.eq.s32.totalorder %s1489_s22, 0 }
   0x8   : > { %p156_p3 = scmp.eq.s32.totalorder %s865_s23, 1  ;;  %p866_p5 = scmp.ge.s32.totalorder %s1428_s21, 1 }
   0x9   : > { %p1498_p4 = por %p1795_p1, %p42_p0  ;;  %p163_p7 = scmp.lt.s32.totalorder %s1428_s21, 3 }
   0xa   : > { %p1503_p6 = por %p156_p3, %p42_p0  ;;  %s1430_s27 = smov [#allocation5]  }
   0xb   : > { %s1798_s24 = scalar_select %p1498_p4, 1, 0 }
   0xc   : > { %s1799_s25 = scalar_select %p1503_p6, 1, 0 }
   0xd   : > { %p1508_p8 = pnand %p866_p5, %p163_p7  ;;  %s175_s28 = sshll.u32 %s1430_s27, 4  ;;  %s1512_s28 = int_to_ptr.vmem [resolvable:$true] %s175_s28 }
   0xe   : > { %s1431_s30 = smov [#allocation7]   ;;  %s1272_s9 = scalar_lea.hbm %s1790_s1, 6144 }
   0xf   : > { %p1213_p9 = pneg %p1508_p8  ;;  %s191_s6 = sshll.u32 %s1431_s30, 4  ;;  %s1523_s6 = int_to_ptr.vmem [resolvable:$true] %s191_s6 }
  0x10   : > { %p1273_p12 = scmp.ne.s32.totalorder %s1790_s1, %s1272_s9  ;;  %p1279_p5 = scmp.lt.u32.totalorder %s1272_s9, %s1790_s1 }
  0x11   : > { %p1519_p11 = pnand %p1213_p9, %p1795_p1 }
  0x13   : > { %p1274_p13 = pneg %p1519_p11 }
  0x15   : > { %p1275_p0 = pnand %p1274_p13, %p1273_p12 }
  0x17   : > { %p1276_p3 = pneg %p1275_p0 }
  0x19   : > { %p1281_p7 = pnand %p1279_p5, %p1276_p3 }
  0x1b   : > { %1284 = shalt.err (!%p1281_p7)
}
  0x1c   : > { %s1285_s14 = scalar_lea.vmem %s1512_s28, 6144  ;;  %p1293_p2 = scmp.lt.s32.totalorder %s1512_s28, %s1512_s28 }
  0x1d   : > { %p1286_p9 = scmp.ne.s32.totalorder %s1512_s28, %s1285_s14  ;;  %p1294_p12 = scmp.lt.s32.totalorder %s1285_s14, %s1285_s14 }
  0x1f   : > { %p1288_p10 = pnand %p1286_p9, %p1274_p13  ;;  %p1295_p0 = por %p1294_p12, %p1293_p2 }
  0x21   : > { %p1289_p1 = pneg %p1288_p10 }
  0x23   : > { %p1296_p6 = pnand %p1295_p0, %p1289_p1 }
  0x25   : > { %1299 = shalt.err (!%p1296_p6)
}
  0x26   : > { %s1432_s15 = smov 128   ;;  %s1433_s16 = smov 8  }
  0x27   : > { %1216 = dma.hbm_to_vmem [thread:$0]  (!%p1519_p11), %s1790_s1, 6144, %s1512_s28, [#allocation6], %s1432_s15, %s1432_s15, %s1433_s16  }
  0x28   : > { %s1300_s7 = scalar_lea.hbm %s1792_s3, 6144 }
  0x29   : > { %p1301_p1 = scmp.ne.s32.totalorder %s1792_s3, %s1300_s7  ;;  %p1307_p10 = scmp.lt.u32.totalorder %s1300_s7, %s1792_s3 }
  0x2b   : > { %p1303_p2 = pnand %p1301_p1, %p1274_p13 }
  0x2d   : > { %p1304_p6 = pneg %p1303_p2 }
  0x2f   : > { %p1309_p3 = pnand %p1307_p10, %p1304_p6 }
  0x31   : > { %1312 = shalt.err (!%p1309_p3)
}
  0x32   : > { %s1313_s28 = scalar_lea.vmem %s1523_s6, 6144  ;;  %p1321_p12 = scmp.lt.s32.totalorder %s1523_s6, %s1523_s6 }
  0x33   : > { %p1314_p5 = scmp.ne.s32.totalorder %s1523_s6, %s1313_s28  ;;  %p1322_p0 = scmp.lt.s32.totalorder %s1313_s28, %s1313_s28 }
  0x35   : > { %p1316_p7 = pnand %p1314_p5, %p1274_p13  ;;  %p1323_p1 = por %p1322_p0, %p1321_p12 }
  0x37   : > { %p1317_p9 = pneg %p1316_p7 }
  0x39   : > { %p1324_p2 = pnand %p1323_p1, %p1317_p9 }
  0x3b   : > { %1327 = shalt.err (!%p1324_p2)
}
  0x3c   : > { %1219 = dma.hbm_to_vmem [thread:$0]  (!%p1519_p11), %s1792_s3, 6144, %s1523_s6, [#allocation6], %s1432_s15, %s1432_s15, %s1433_s16  }
  0x3d   : > { %s1584_s29 = sadd.s32 1, %s1428_s21   ;;  %s29_s14 = sadd.s32 1, %s1424_s20 }
  0x3e   : > { %s26_s17 = ssub.s32 %s1428_s21, %s1584_s29  ;;  %p36_p13 = scmp.ne.s32.totalorder %s1424_s20, %s1420_s19 }
  0x3f   : > { %p27_p6 = scmp.eq.s32.totalorder %s26_s17, 0  ;;  %p37_p10 = scmp.eq.s32.totalorder %s1428_s21, 0 }
  0x40   : > { %p1802_p3 = scmp.eq.s32.totalorder %s1489_s22, 1  ;;  %p1230_p7 = scmp.lt.s32.totalorder %s1428_s21, 2 }
  0x41   : > { %s1600_s27 = scalar_select %p27_p6, %s1424_s20, %s29_s14  }
  0x42   : > { %p1594_p5 = por %p1802_p3, %p36_p13  ;;  %p38_p9 = por %p37_p10, %p36_p13 }
  0x43   : > { %s208_s30 = sand.u32 1, %s1424_s20   ;;  %s889_s6 = sshll.u32 %s1428_s21, 8 }
  0x44   : > { %s1803_s23 = scalar_select %p1594_p5, 1, 0 }
  0x45   : > { %s870_s7 = sshll.u32 %s208_s30, 4  ;;  %s1607_s10 = scalar_lea.hbm %s1789_s0, %s889_s6 }
  0x46   : > { %s212_s11 = scalar_lea.vmem [#allocation2], %s870_s7  ;;  %p1611_p11 = pnand %p1230_p7, %p38_p9 }
  0x47   : > { %s219_s28 = sshll.u32 %s212_s11, 4  ;;  %s1615_s13 = scalar_lea.sflag [#allocation3], %s208_s30  ;;  %s1609_s28 = int_to_ptr.vmem [resolvable:$true] %s219_s28 }
  0x48   : > { %s1328_s14 = scalar_lea.hbm %s1607_s10, 256  ;;  %p1330_p0 = pneg %p1611_p11 }
  0x49   : > { %p1329_p12 = scmp.ne.s32.totalorder %s1607_s10, %s1328_s14  ;;  %s1333_s6 = scalar_lea.hbm %s1789_s0, 512 }
  0x4a   : > { %p1334_p13 = scmp.lt.u32.totalorder %s1607_s10, %s1789_s0  ;;  %p1335_p6 = scmp.lt.u32.totalorder %s1333_s6, %s1328_s14 }
  0x4b   : > { %p1331_p1 = pnand %p1330_p0, %p1329_p12  ;;  %p1337_p3 = scmp.lt.u32.totalorder %s1328_s14, %s1607_s10 }
  0x4c   : > { %p1336_p10 = por %p1335_p6, %p1334_p13 }
  0x4d   : > { %p1332_p2 = pneg %p1331_p1 }
  0x4e   : > { %p1338_p7 = por %p1337_p3, %p1336_p10 }
  0x50   : > { %p1339_p9 = pnand %p1338_p7, %p1332_p2 }
  0x52   : > { %1342 = shalt.err (!%p1339_p9)
}
  0x53   : > { %s1343_s30 = scalar_lea.vmem %s1609_s28, 256  ;;  %s1434_s11 = smov [#allocation2]  }
  0x54   : > { %p1344_p12 = scmp.ne.s32.totalorder %s1609_s28, %s1343_s30  ;;  %s1348_s17 = sshll.u32 %s1434_s11, 4  ;;  %s1349_s17 = int_to_ptr.vmem [resolvable:$false] %s1348_s17 }
  0x55   : > { %s1350_s7 = scalar_lea.vmem %s1349_s17, 512  ;;  %p1351_p4 = scmp.lt.s32.totalorder %s1609_s28, %s1349_s17 }
  0x56   : > { %p1346_p1 = pnand %p1344_p12, %p1330_p0  ;;  %p1352_p13 = scmp.lt.s32.totalorder %s1350_s7, %s1343_s30 }
  0x58   : > { %p1347_p5 = pneg %p1346_p1  ;;  %p1353_p6 = por %p1352_p13, %p1351_p4 }
  0x5a   : > { %p1354_p10 = pnand %p1353_p6, %p1347_p5 }
  0x5c   : > { %1357 = shalt.err (!%p1354_p10)
}
  0x5d   : > { %1223 = dma.hbm_to_vmem [thread:$0]  (!%p1611_p11), %s1607_s10, 256, %s1609_s28, %s1615_s13, %s1432_s15, %s1432_s15, %s1433_s16  }
  0x5e   : > { %231 = sbr.rel (%p1508_p8) target bundleno = 608 (0x260), region = 40  ;;  %s1649_s14 = sand.u32 (!%p1508_p8), 1, %s1420_s19  }
  0x5f   : > { %s874_s6 = sshll.u32 (!%p1508_p8), %s1649_s14, 4  ;;  %s234_s8 = scalar_lea.sflag (!%p1508_p8), [#allocation3], %s1649_s14 }
  0x60   : > { %s1655_s12 = scalar_lea.vmem (!%p1508_p8), [#allocation2], %s874_s6  ;;  %p1805_p4 = scmp.ne.s32.totalorder (!%p1508_p8), %s1798_s24, 0 }
  0x65   : > { %1403 = dma.done.wait (%p1805_p4), %s234_s8, 256  }
  0x66   : > { %1405 = vsyncadd (%p1805_p4), %s234_s8, 4294967040  ;;  %p1806_p5 = scmp.eq.s32.totalorder %s1489_s22, 0 }
  0x68   : > { %1407 = dma.done.wait (%p1806_p5), [#allocation6], 12288   ;;  %p1807_p8 = pmov %p1806_p5 }
  0x69   : > { %v347_v0 = vld [vmem:[#allocation5 + $0x80] sm:$0xff]  ;;  %v348_v1 = vld [vmem:[#allocation5 + $0x88] sm:$0xff]  ;;  %v349_v5 = vld [vmem:[#allocation5 + $0x90] sm:$0xff]  ;;  %v276_v37 = vlaneseq  ;;  %s271_s10 = scalar_lea.vmem [#allocation8], %s874_s6  ;;  %s890_s13 = sshll.u32 %s1489_s22, 8 }
  0x6a   : > { %1409 = vsyncadd (%p1807_p8), [#allocation6], 4294955008  ;;  %v331_v2 = vld [vmem:[#allocation5] sm:$0xff]  ;;  %v1073_v3 = vpack.c.bf16 %v348_v1, %v347_v0  ;;  %v332_v4 = vld [vmem:[#allocation5 + $0x8] sm:$0xff]  ;;  %s773_s28 = sshll.u32 %s271_s10, 4  ;;  %s1744_s11 = scalar_lea.hbm %s1794_s5, %s890_s13  ;;  %s1739_s28 = int_to_ptr.vmem [resolvable:$true] %s773_s28 }
  0x6b   : > { %v350_v6 = vld [vmem:[#allocation5 + $0x98] sm:$0xff]  ;;  %v1075_v7 = vpack.c.bf16 %v332_v4, %v331_v2  ;;  %v363_v9 = vld [vmem:[#allocation5 + $0x100] sm:$0xff]  ;;  %v364_v10 = vld [vmem:[#allocation5 + $0x108] sm:$0xff]  ;;  %v1671_v49 = vshrl.u32 %v276_v37, 7  ;;  %s760_s17 = scalar_lea.sflag [#allocation4], %s1649_s14  ;;  %s1358_s7 = scalar_lea.vmem %s1739_s28, 256 }
  0x6c   : > { %v1077_v8 = vpack.c.bf16 %v350_v6, %v349_v5  ;;  %v333_v11 = vld [vmem:[#allocation5 + $0x10] sm:$0xff]  ;;  %1074 = vmatprep.subr.bf16.mxu0 %v1073_v3  ;;  %v1105_v12 = vpack.c.bf16 %v364_v10, %v363_v9  ;;  %v334_v13 = vld [vmem:[#allocation5 + $0x18] sm:$0xff]  ;;  %v351_v14 = vld [vmem:[#allocation5 + $0xa0] sm:$0xff]  ;;  %p1359_p11 = scmp.ne.s32.totalorder %s1739_s28, %s1358_s7  ;;  %p1812_p0 = scmp.ne.s32.totalorder %s1803_s23, 0 }
  0x6d   : > { %v352_v15 = vld [vmem:[#allocation5 + $0xa8] sm:$0xff]  ;;  %1076 = vmatpush3.bf16.msra.mxu0 %v1075_v7  ;;  %v1079_v16 = vpack.c.bf16 %v334_v13, %v333_v11  ;;  %v365_v17 = vld [vmem:[#allocation5 + $0x110] sm:$0xff]  ;;  %v366_v18 = vld [vmem:[#allocation5 + $0x118] sm:$0xff]  ;;  %vm326_vm0 = vcmp.lt.s32.totalorder %v1671_v49, 7  ;;  %vm319_vm1 = vcmp.lt.s32.totalorder %v1671_v49, 1  ;;  %s1435_s22 = smov [#allocation8]  }
  0x6e   : > { %1078 = vmatprep.subr.bf16.mxu0 %v1077_v8  ;;  %1106 = vmatprep.subr.bf16.mxu1 %v1105_v12  ;;  %v1081_v19 = vpack.c.bf16 %v352_v15, %v351_v14  ;;  %v1109_v20 = vpack.c.bf16 %v366_v18, %v365_v17  ;;  %v335_v21 = vld [vmem:[#allocation5 + $0x20] sm:$0xff]  ;;  %v336_v22 = vld [vmem:[#allocation5 + $0x28] sm:$0xff]  ;;  %v353_v23 = vld [vmem:[#allocation5 + $0xb0] sm:$0xff]  ;;  %v278_v15 = vadd.s32 8, %v1671_v49  ;;  %p1360_p2 = pnand %p1359_p11, %p1812_p0  ;;  %s1362_s6 = sshll.u32 %s1435_s22, 4  ;;  %s1363_s6 = int_to_ptr.vmem [resolvable:$false] %s1362_s6 }
  0x6f   : > { %1108 = vmatpush3.bf16.msra.mxu1 %v1105_v12  ;;  %v354_v24 = vld [vmem:[#allocation5 + $0xb8] sm:$0xff]  ;;  %v367_v25 = vld [vmem:[#allocation5 + $0x120] sm:$0xff]  ;;  %v368_v26 = vld [vmem:[#allocation5 + $0x128] sm:$0xff]  ;;  %v1083_v28 = vpack.c.bf16 %v336_v22, %v335_v21  ;;  %s1364_s8 = scalar_lea.vmem %s1363_s6, 512  ;;  %p1365_p7 = scmp.lt.s32.totalorder %s1739_s28, %s1363_s6 }
  0x70   : > { %1110 = vmatprep.subr.bf16.mxu1 %v1109_v20  ;;  %v1113_v27 = vpack.c.bf16 %v368_v26, %v367_v25  ;;  %v369_v29 = vld [vmem:[#allocation5 + $0x130] sm:$0xff]  ;;  %v370_v30 = vld [vmem:[#allocation5 + $0x138] sm:$0xff]  ;;  %v1085_v31 = vpack.c.bf16 %v354_v24, %v353_v23  ;;  %v355_v34 = vld [vmem:[#allocation5 + $0xc0] sm:$0xff]  ;;  %p1361_p3 = pneg %p1360_p2  ;;  %p1366_p9 = scmp.lt.s32.totalorder %s1364_s8, %s1358_s7 }
  0x71   : > { %1080 = vmatpush3.bf16.msra.mxu0 %v1079_v16  ;;  %v337_v32 = vld [vmem:[#allocation5 + $0x30] sm:$0xff]  ;;  %v338_v33 = vld [vmem:[#allocation5 + $0x38] sm:$0xff]  ;;  %v356_v35 = vld [vmem:[#allocation5 + $0xc8] sm:$0xff]  ;;  %v1117_v36 = vpack.c.bf16 %v370_v30, %v369_v29 }
  0x72   : > { %1082 = vmatprep.subr.bf16.mxu0 %v1081_v19  ;;  %v1087_v38 = vpack.c.bf16 %v338_v33, %v337_v32  ;;  %v371_v39 = vld [vmem:[#allocation5 + $0x140] sm:$0xff]  ;;  %v372_v40 = vld [vmem:[#allocation5 + $0x148] sm:$0xff]  ;;  %v1089_v41 = vpack.c.bf16 %v356_v35, %v355_v34  ;;  %v357_v44 = vld [vmem:[#allocation5 + $0xd0] sm:$0xff]  ;;  %p1367_p12 = por %p1366_p9, %p1365_p7 }
  0x73   : > { %1112 = vmatpush3.bf16.msra.mxu1 %v1109_v20  ;;  %v339_v42 = vld [vmem:[#allocation5 + $0x40] sm:$0xff]  ;;  %v340_v43 = vld [vmem:[#allocation5 + $0x48] sm:$0xff]  ;;  %v358_v45 = vld [vmem:[#allocation5 + $0xd8] sm:$0xff]  ;;  %v1121_v46 = vpack.c.bf16 %v372_v40, %v371_v39  ;;  %v283_v20 = vand.u32 15, %v1671_v49 }
  0x74   : > { %1114 = vmatprep.subr.bf16.mxu1 %v1113_v27  ;;  %v1666_v47 = vld [vmem:[%s1655_s12] sm:$0xff]  ;;  %v1669_v48 = vld [vmem:[%s1655_s12 + $0x8] sm:$0xff]  ;;  %v1091_v50 = vpack.c.bf16 %v340_v43, %v339_v42  ;;  %v1093_v55 = vpack.c.bf16 %v358_v45, %v357_v44  ;;  %p1368_p1 = pnand %p1367_p12, %p1361_p3 }
  0x75   : > { %1084 = vmatpush3.bf16.msra.mxu0 %v1083_v28  ;;  %v373_v51 = vld [vmem:[#allocation5 + $0x150] sm:$0xff]  ;;  %v374_v52 = vld [vmem:[#allocation5 + $0x158] sm:$0xff]  ;;  %v1674_v53 = vmax.f32 %v1666_v47, 0.0  ;;  %v1677_v54 = vmax.f32 %v1669_v48, 0.0  ;;  %v359_v58 = vld [vmem:[#allocation5 + $0xe0] sm:$0xff]  ;;  %v290_v28 = vand.u32 15, %v278_v15 }
  0x76   : > { %1086 = vmatprep.subr.bf16.mxu0 %v1085_v31  ;;  %v341_v56 = vld [vmem:[#allocation5 + $0x50] sm:$0xff]  ;;  %v342_v57 = vld [vmem:[#allocation5 + $0x58] sm:$0xff]  ;;  %v360_v59 = vld [vmem:[#allocation5 + $0xe8] sm:$0xff]  ;;  %v1125_v62 = vpack.c.bf16 %v374_v52, %v373_v51  ;;  %vm1694_vm2 = vcmp.ge.s32.totalorder %v283_v20, 1 }
  0x77   : > { %1116 = vmatpush3.bf16.msra.mxu1 %v1113_v27  ;;  %450 = vmatprep.mubr.f32.mxu0 %v1674_v53  ;;  %v324_v60 = vrot.slane %v1674_v53, 1  ;;  %v325_v61 = vrot.slane %v1677_v54, 1  ;;  %v1095_v63 = vpack.c.bf16 %v342_v57, %v341_v56  ;;  %v375_v0 = vld [vmem:[#allocation5 + $0x160] sm:$0xff]  ;;  %v376_v1 = vld [vmem:[#allocation5 + $0x168] sm:$0xff]  ;;  %v1097_v3 = vpack.c.bf16 %v360_v59, %v359_v58  ;;  %v361_v6 = vld [vmem:[#allocation5 + $0xf0] sm:$0xff] }
  0x78   : > { %1118 = vmatprep.subr.bf16.mxu1 %v1117_v36  ;;  %v343_v4 = vld [vmem:[#allocation5 + $0x60] sm:$0xff]  ;;  %v344_v5 = vld [vmem:[#allocation5 + $0x68] sm:$0xff]  ;;  %v362_v7 = vld [vmem:[#allocation5 + $0xf8] sm:$0xff]  ;;  %v1129_v8 = vpack.c.bf16 %v376_v1, %v375_v0  ;;  %v317_v21 = vrot.slane %v1674_v53, 7  ;;  %v318_v22 = vrot.slane %v1677_v54, 7  ;;  %vm1700_vm3 = vcmp.lt.s32.totalorder %v290_v28, 15 }
  0x79   : > { %1088 = vmatpush3.bf16.msra.mxu0 %v1087_v38  ;;  %v327_v2 = vsel %vm326_vm0, %v324_v60, %v325_v61  ;;  %v1099_v9 = vpack.c.bf16 %v344_v5, %v343_v4  ;;  %v377_v10 = vld [vmem:[#allocation5 + $0x170] sm:$0xff]  ;;  %v378_v11 = vld [vmem:[#allocation5 + $0x178] sm:$0xff]  ;;  %v1101_v12 = vpack.c.bf16 %v362_v7, %v361_v6  ;;  %v566_v16 = vld [vmem:[#allocation7 + $0x80] sm:$0xff] }
  0x7a   : > { %1090 = vmatprep.subr.bf16.mxu0 %v1089_v41  ;;  %1035 = vmatprep.mubr.f32.mxu1 %v327_v2  ;;  %v345_v13 = vld [vmem:[#allocation5 + $0x70] sm:$0xff]  ;;  %v346_v14 = vld [vmem:[#allocation5 + $0x78] sm:$0xff]  ;;  %v567_v17 = vld [vmem:[#allocation7 + $0x88] sm:$0xff]  ;;  %v1133_v18 = vpack.c.bf16 %v378_v11, %v377_v10  ;;  %v321_v33 = vsel %vm319_vm1, %v318_v22, %v317_v21  ;;  %v328_v41 = vsel %vm326_vm0, %v325_v61, %v324_v60 }
  0x7b   : > { %1120 = vmatpush3.bf16.msra.mxu1 %v1117_v36  ;;  %v1103_v19 = vpack.c.bf16 %v346_v14, %v345_v13  ;;  %v582_v23 = vld [vmem:[#allocation7 + $0x100] sm:$0xff]  ;;  %v583_v24 = vld [vmem:[#allocation7 + $0x108] sm:$0xff]  ;;  %v1137_v25 = vpack.c.bf16 %v567_v17, %v566_v16  ;;  %v568_v29 = vld [vmem:[#allocation7 + $0x90] sm:$0xff]  ;;  %v320_v45 = vsel %vm319_vm1, %v317_v21, %v318_v22 }
  0x7c   : > { %1122 = vmatprep.subr.bf16.mxu1 %v1121_v46  ;;  %v550_v26 = vld [vmem:[#allocation7] sm:$0xff]  ;;  %v551_v27 = vld [vmem:[#allocation7 + $0x8] sm:$0xff]  ;;  %v569_v30 = vld [vmem:[#allocation7 + $0x98] sm:$0xff]  ;;  %v1169_v31 = vpack.c.bf16 %v583_v24, %v582_v23 }
  0x7d   : > { %1092 = vmatpush3.bf16.msra.mxu0 %v1091_v50  ;;  %v1139_v34 = vpack.c.bf16 %v551_v27, %v550_v26  ;;  %v584_v35 = vld [vmem:[#allocation7 + $0x110] sm:$0xff]  ;;  %v585_v36 = vld [vmem:[#allocation7 + $0x118] sm:$0xff]  ;;  %v1141_v37 = vpack.c.bf16 %v569_v30, %v568_v29  ;;  %v570_v42 = vld [vmem:[#allocation7 + $0xa0] sm:$0xff] }
  0x7e   : > { %1094 = vmatprep.subr.bf16.mxu0 %v1093_v55  ;;  %v552_v38 = vld [vmem:[#allocation7 + $0x10] sm:$0xff]  ;;  %v553_v39 = vld [vmem:[#allocation7 + $0x18] sm:$0xff]  ;;  %v571_v43 = vld [vmem:[#allocation7 + $0xa8] sm:$0xff]  ;;  %v1173_v44 = vpack.c.bf16 %v585_v36, %v584_v35 }
  0x7f   : > { %1124 = vmatpush3.bf16.msra.mxu1 %v1121_v46  ;;  %v1143_v46 = vpack.c.bf16 %v553_v39, %v552_v38  ;;  %v586_v50 = vld [vmem:[#allocation7 + $0x120] sm:$0xff]  ;;  %v587_v51 = vld [vmem:[#allocation7 + $0x128] sm:$0xff]  ;;  %v1145_v52 = vpack.c.bf16 %v571_v43, %v570_v42  ;;  %v572_v56 = vld [vmem:[#allocation7 + $0xb0] sm:$0xff] }
  0x80   : > { %1126 = vmatprep.subr.bf16.mxu1 %v1125_v62  ;;  %v554_v53 = vld [vmem:[#allocation7 + $0x20] sm:$0xff]  ;;  %v555_v55 = vld [vmem:[#allocation7 + $0x28] sm:$0xff]  ;;  %v573_v57 = vld [vmem:[#allocation7 + $0xb8] sm:$0xff] }
  0x81   : > { %1096 = vmatpush3.bf16.msra.mxu0 %v1095_v63  ;;  %v1147_v58 = vpack.c.bf16 %v555_v55, %v554_v53  ;;  %v588_v59 = vld [vmem:[#allocation7 + $0x130] sm:$0xff]  ;;  %v589_v60 = vld [vmem:[#allocation7 + $0x138] sm:$0xff]  ;;  %v1149_v61 = vpack.c.bf16 %v573_v57, %v572_v56  ;;  %v574_v2 = vld [vmem:[#allocation7 + $0xc0] sm:$0xff] }
  0x82   : > { %1098 = vmatprep.subr.bf16.mxu0 %v1097_v3  ;;  %v557_v63 = vld [vmem:[#allocation7 + $0x38] sm:$0xff]  ;;  %v1181_v0 = vpack.c.bf16 %v589_v60, %v588_v59  ;;  %v575_v3 = vld [vmem:[#allocation7 + $0xc8] sm:$0xff]  ;;  %v558_v5 = vld [vmem:[#allocation7 + $0x40] sm:$0xff] }
  0x83   : > { %1128 = vmatpush3.bf16.msra.mxu1 %v1125_v62  ;;  %v556_v62 = vld [vmem:[#allocation7 + $0x30] sm:$0xff]  ;;  %v1153_v4 = vpack.c.bf16 %v575_v3, %v574_v2  ;;  %v559_v6 = vld [vmem:[#allocation7 + $0x48] sm:$0xff]  ;;  %v590_v7 = vld [vmem:[#allocation7 + $0x140] sm:$0xff] }
  0x84   : > { %1130 = vmatprep.subr.bf16.mxu1 %v1129_v8  ;;  %v1151_v1 = vpack.c.bf16 %v557_v63, %v556_v62  ;;  %v576_v11 = vld [vmem:[#allocation7 + $0xd0] sm:$0xff]  ;;  %v561_v15 = vld [vmem:[#allocation7 + $0x58] sm:$0xff]  ;;  %v578_v20 = vld [vmem:[#allocation7 + $0xe0] sm:$0xff] }
  0x85   : > { %1100 = vmatpush3.bf16.msra.mxu0 %v1099_v9  ;;  %v591_v9 = vld [vmem:[#allocation7 + $0x148] sm:$0xff]  ;;  %v560_v14 = vld [vmem:[#allocation7 + $0x50] sm:$0xff]  ;;  %v562_v23 = vld [vmem:[#allocation7 + $0x60] sm:$0xff] }
  0x86   : > { %1102 = vmatprep.subr.bf16.mxu0 %v1101_v12  ;;  %v1185_v10 = vpack.c.bf16 %v591_v9, %v590_v7  ;;  %v577_v12 = vld [vmem:[#allocation7 + $0xd8] sm:$0xff]  ;;  %v1159_v16 = vpack.c.bf16 %v561_v15, %v560_v14  ;;  %v592_v17 = vld [vmem:[#allocation7 + $0x150] sm:$0xff]  ;;  %v579_v21 = vld [vmem:[#allocation7 + $0xe8] sm:$0xff] }
  0x87   : > { %1132 = vmatpush3.bf16.msra.mxu1 %v1129_v8  ;;  %v1155_v8 = vpack.c.bf16 %v559_v6, %v558_v5  ;;  %v1157_v13 = vpack.c.bf16 %v577_v12, %v576_v11  ;;  %v1161_v22 = vpack.c.bf16 %v579_v21, %v578_v20  ;;  %v563_v24 = vld [vmem:[#allocation7 + $0x68] sm:$0xff]  ;;  %v580_v29 = vld [vmem:[#allocation7 + $0xf0] sm:$0xff]  ;;  %v581_v30 = vld [vmem:[#allocation7 + $0xf8] sm:$0xff] }
  0x88   : > { %1134 = vmatprep.subr.bf16.mxu1 %v1133_v18  ;;  %v1163_v26 = vpack.c.bf16 %v563_v24, %v562_v23  ;;  %v595_v27 = vld [vmem:[#allocation7 + $0x168] sm:$0xff]  ;;  %v596_v35 = vld [vmem:[#allocation7 + $0x170] sm:$0xff]  ;;  %v878_v42 = vld [vmem:[%s1791_s2] ss:$0 sm:$0xff] }
  0x89   : > { %1104 = vmatpush3.bf16.msra.mxu0 %v1103_v19  ;;  %v881_v5 = vld [vmem:[%s1793_s4] ss:$0 sm:$0xff] }
  0x8a   : > { %1138 = vmatprep.subr.bf16.mxu0 %v1137_v25  ;;  %v594_v25 = vld [vmem:[#allocation7 + $0x160] sm:$0xff] }
  0x8b   : > { %1136 = vmatpush3.bf16.msra.mxu1 %v1133_v18  ;;  %v593_v18 = vld [vmem:[#allocation7 + $0x158] sm:$0xff]  ;;  %v1193_v28 = vpack.c.bf16 %v595_v27, %v594_v25 }
  0x8c   : > { %879 = vmatmul.mubr.msk.f32.vlgmr.msra.gmra.mrb[0].mxu0 %vm1694_vm2, %v321_v33  ;;  %1170 = vmatprep.subr.bf16.mxu1 %v1169_v31  ;;  %v1189_v19 = vpack.c.bf16 %v593_v18, %v592_v17  ;;  %v564_v33 = vld [vmem:[#allocation7 + $0x70] sm:$0xff] }
  0x8d   : > { %455 = vmatprep.mubr.f32.mxu0 %v1677_v54  ;;  %1140 = vmatpush3.bf16.msra.mxu0 %v1139_v34  ;;  %v1177_v54 = vpack.c.bf16 %v587_v51, %v586_v50  ;;  %v565_v34 = vld [vmem:[#allocation7 + $0x78] sm:$0xff] }
  0x8e   : > { %1036 = vmatmul.mubr.msk.f32.vlgmr.msra.gmra.mrb[0].mxu1 %vm1700_vm3, %v328_v41  ;;  %1142 = vmatprep.subr.bf16.mxu0 %v1141_v37  ;;  %v1167_v36 = vpack.c.bf16 %v565_v34, %v564_v33  ;;  %v597_v37 = vld [vmem:[#allocation7 + $0x178] sm:$0xff] }
  0x8f   : > { %1172 = vmatpush3.bf16.msra.mxu1 %v1169_v31  ;;  %v1165_v31 = vpack.c.bf16 %v581_v30, %v580_v29  ;;  %v1197_v38 = vpack.c.bf16 %v597_v37, %v596_v35 }
  0x90   : > { %456 = vmatmul.mubr.f32.gmra.mrb[2].mxu0 %v320_v45  ;;  %1174 = vmatprep.subr.bf16.mxu1 %v1173_v44 }
  0x91   : > { %1144 = vmatpush3.bf16.msra.mxu0 %v1143_v46 }
  0x92   : > { %1146 = vmatprep.subr.bf16.mxu0 %v1145_v52 }
  0x93   : > { %1176 = vmatpush3.bf16.msra.mxu1 %v1173_v44 }
  0x94   : > { %1178 = vmatprep.subr.bf16.mxu1 %v1177_v54 }
  0x95   : > { %1148 = vmatpush3.bf16.msra.mxu0 %v1147_v58 }
  0x96   : > { %1150 = vmatprep.subr.bf16.mxu0 %v1149_v61 }
  0x97   : > { %1180 = vmatpush3.bf16.msra.mxu1 %v1177_v54 }
  0x98   : > { %1182 = vmatprep.subr.bf16.mxu1 %v1181_v0 }
  0x99   : > { %1152 = vmatpush3.bf16.msra.mxu0 %v1151_v1 }
  0x9a   : > { %1154 = vmatprep.subr.bf16.mxu0 %v1153_v4 }
  0x9b   : > { %1184 = vmatpush3.bf16.msra.mxu1 %v1181_v0 }
  0x9c   : > { %1186 = vmatprep.subr.bf16.mxu1 %v1185_v10 }
  0x9d   : > { %1156 = vmatpush3.bf16.msra.mxu0 %v1155_v8 }
  0x9e   : > { %1158 = vmatprep.subr.bf16.mxu0 %v1157_v13 }
  0x9f   : > { %1188 = vmatpush3.bf16.msra.mxu1 %v1185_v10 }
  0xa0   : > { %1190 = vmatprep.subr.bf16.mxu1 %v1189_v19 }
  0xa1   : > { %1160 = vmatpush3.bf16.msra.mxu0 %v1159_v16 }
  0xa2   : > { %1162 = vmatprep.subr.bf16.mxu0 %v1161_v22 }
  0xa3   : > { %1192 = vmatpush3.bf16.msra.mxu1 %v1189_v19 }
  0xa4   : > { %1194 = vmatprep.subr.bf16.mxu1 %v1193_v28 }
  0xa5   : > { %1164 = vmatpush3.bf16.msra.mxu0 %v1163_v26 }
  0xa6   : > { %1166 = vmatprep.subr.bf16.mxu0 %v1165_v31 }
  0xa7   : > { %1196 = vmatpush3.bf16.msra.mxu1 %v1193_v28 }
  0xa8   : > { %1198 = vmatprep.subr.bf16.mxu1 %v1197_v38 }
  0xa9   : > { %1168 = vmatpush3.bf16.msra.mxu0 %v1167_v36 }
  0xab   : > { %1200 = vmatpush3.bf16.msra.mxu1 %v1197_v38 }
 0x15f   : > { %v923_v39 = vpop.f32.mrb[0].mxu0 }
 0x160   : > { %v924_v41 = vpop.f32.mrb[1].mxu0 }
 0x161   : > { %v925_v43 = vadd.f32 %v924_v41, %v923_v39  ;;  %v1037_v44 = vpop.f32.mrb[0].mxu1 }
 0x162   : > { %v527_v45 = vpop.f32.mrb[1].mxu1 }
 0x163   : > { %v926_v46 = vpop.f32.mrb[2].mxu0  ;;  %v453_v50 = vadd.f32 %v925_v43, %v878_v42 }
 0x164   : > { %v927_v51 = vpop.f32.mrb[3].mxu0 }
 0x165   : > { %v928_v52 = vadd.f32 %v927_v51, %v926_v46  ;;  %v528_v53 = vadd.f32 %v527_v45, %v453_v50 }
 0x167   : > { %v458_v55 = vadd.f32 %v928_v52, %v878_v42  ;;  %v536_v56 = vmax.f32 %v528_v53, 0.0 }
 0x169   : > { %v533_v57 = vadd.f32 %v1037_v44, %v458_v55  ;;  %669 = vmatprep.mubr.f32.mxu0 %v536_v56  ;;  %v538_v59 = vrot.slane %v536_v56, 7  ;;  %v544_v60 = vrot.slane %v536_v56, 1 }
 0x16b   : > { %v537_v54 = vmax.f32 %v533_v57, 0.0 }
 0x16d   : > { %v539_v58 = vrot.slane %v537_v54, 7  ;;  %v545_v61 = vrot.slane %v537_v54, 1 }
 0x16f   : > { %v541_v62 = vsel %vm319_vm1, %v539_v58, %v538_v59  ;;  %v546_v63 = vsel %vm326_vm0, %v544_v60, %v545_v61  ;;  %v547_v0 = vsel %vm326_vm0, %v545_v61, %v544_v60  ;;  %v540_v1 = vsel %vm319_vm1, %v538_v59, %v539_v58 }
 0x170   : > { %882 = vmatmul.mubr.msk.f32.vlgmr.msra.gmra.mrb[4].mxu0 %vm1694_vm2, %v541_v62  ;;  %1070 = vmatprep.mubr.f32.mxu1 %v546_v63 }
 0x171   : > { %674 = vmatprep.mubr.f32.mxu0 %v537_v54  ;;  %1071 = vmatmul.mubr.msk.f32.vlgmr.msra.gmra.mrb[2].mxu1 %vm1700_vm3, %v547_v0 }
 0x174   : > { %675 = vmatmul.mubr.f32.gmra.mrb[6].mxu0 %v540_v1 }
 0x243   : > { %v979_v2 = vpop.f32.mrb[4].mxu0 }
 0x244   : > { %v980_v3 = vpop.f32.mrb[5].mxu0  ;;  %v1072_v4 = vpop.f32.mrb[2].mxu1 }
 0x245   : > { %v981_v49 = vadd.f32 %v980_v3, %v979_v2  ;;  %v746_v6 = vpop.f32.mrb[3].mxu1 }
 0x247   : > { %v672_v7 = vadd.f32 %v981_v49, %v881_v5  ;;  %v982_v32 = vpop.f32.mrb[6].mxu0 }
 0x248   : > { %v983_v8 = vpop.f32.mrb[7].mxu0 }
 0x249   : > { %v747_v9 = vadd.f32 %v746_v6, %v672_v7  ;;  %v984_v10 = vadd.f32 %v983_v8, %v982_v32 }
 0x24b   : > { %v755_v40 = vadd.f32 %v747_v9, %v1666_v47  ;;  %v677_v11 = vadd.f32 %v984_v10, %v881_v5 }
 0x24d   : > { %757 = vst [vmem:[%s271_s10] sm:$0xff] %v755_v40  ;;  %v752_v12 = vadd.f32 %v1072_v4, %v677_v11 }
 0x24f   : > { %v756_v13 = vadd.f32 %v752_v12, %v1669_v48 }
 0x251   : > { %758 = vst [vmem:[%s271_s10 + $0x8] sm:$0xff] %v756_v13 }
 0x252   : > { %1371 = shalt.err (!%p1368_p1)
}
 0x253   : > { %s1372_s12 = scalar_lea.hbm %s1744_s11, 256  ;;  %s1376_s15 = scalar_lea.hbm %s1794_s5, 512 }
 0x254   : > { %p1373_p13 = scmp.ne.s32.totalorder %s1744_s11, %s1372_s12  ;;  %p1377_p4 = scmp.lt.u32.totalorder %s1744_s11, %s1794_s5 }
 0x255   : > { %p1378_p5 = scmp.lt.u32.totalorder %s1376_s15, %s1372_s12  ;;  %p1380_p11 = scmp.lt.u32.totalorder %s1372_s12, %s1744_s11 }
 0x256   : > { %p1374_p6 = pnand %p1373_p13, %p1812_p0 }
 0x257   : > { %p1379_p8 = por %p1378_p5, %p1377_p4 }
 0x258   : > { %p1375_p10 = pneg %p1374_p6 }
 0x259   : > { %p1381_p2 = por %p1380_p11, %p1379_p8 }
 0x25b   : > { %p1382_p3 = pnand %p1381_p2, %p1375_p10 }
 0x25d   : > { %1385 = shalt.err (!%p1382_p3)
}
 0x25e   : > { %s1436_s13 = smov 128   ;;  %s1437_s9 = smov 8  }
 0x25f   : > { %1211 = dma.vmem_to_hbm [thread:$0]  (%p1812_p0), %s1739_s28, 256, %s1744_s11, %s760_s17, %s1436_s13, %s1436_s13, %s1437_s9  }
 0x260 PF: > { %s788_s30 = sand.u32 1, %s1416_s18   ;;  %p1813_p7 = scmp.ne.s32.totalorder %s1799_s25, 0 }
 0x261   : > { %p1814_p9 = scmp.ge.s32.totalorder %s1428_s21, 2  ;;  %s789_s7 = scalar_lea.sflag [#allocation4], %s788_s30 }
 0x263   : > { %p1225_p12 = pnand %p1814_p9, %p1813_p7 }
 0x265   : > { %1411 = dma.done.wait (!%p1225_p12), %s789_s7, 256  }
 0x266   : > { %1413 = vsyncadd (!%p1225_p12), %s789_s7, 4294967040  ;;  %p19_p1 = scmp.ge.s32.totalorder %s1584_s29, 4   ;;  %s1815_s18 = smov %s1420_s19 }
 0x267   : > { %s1816_s19 = smov %s1424_s20  ;;  %s1817_s20 = smov %s1600_s27 }
 0x268   : > { %s1818_s21 = smov %s1584_s29  ;;  %21 = sbr.rel (!%p19_p1) target bundleno = 6 (0x6), region = 93 }
 0x26f   :  { %794 = vsyncpa [#allocation3], 1 }
 0x270   :  { %796 = vsyncpa [#allocation3 + $0x1], 1 }
 0x271   :  { %797 = vsyncpa [#allocation6], 1 }
 0x272   :  { %798 = vsyncpa [#allocation4], 1 }
 0x273   :  { %800 = vsyncpa [#allocation4 + $0x1], 1 }

</bundles_post_ra>
